<compile_context>
chip_gen: v5e
topology: v5e:2x2
jax: 0.10.0
libtpu: 0.0.40
codegen_flags: <defaults>
</compile_context>

<pallas_src>
import functools

import jax
import jax.numpy as jnp
from jax.experimental import pallas as pl
from jax.experimental.pallas import tpu as pltpu

LANE = 128      # padded obs / hidden / action width (lane-dense)
B_TILE = 128    # batch rows per grid step

# Packed-parameter layout: rows of one (PARAM_ROWS, 128) f32 buffer.
W1_ROW = 0                  # rows [  0, 128): W1 padded to (128, 128)
W2_ROW = LANE               # rows [128, 256): W2 padded to (128, 128)
B1_ROW = 2 * LANE           # row  256       : b1 padded to (1, 128)
B2_ROW = 2 * LANE + 1       # row  257       : b2 padded to (1, 128)
PARAM_ROWS = 2 * LANE + 8   # 264 rows (multiple of 8 for clean sublane tiling)


def brain_kernel(x_ref, p_ref, o_ref):
    # Static views into the single packed, VMEM-resident parameter buffer.
    w1 = p_ref[W1_ROW:W1_ROW + LANE, :]      # (128, 128)
    w2 = p_ref[W2_ROW:W2_ROW + LANE, :]      # (128, 128)
    b1 = p_ref[B1_ROW:B1_ROW + 1, :]         # (1, 128)
    b2 = p_ref[B2_ROW:B2_ROW + 1, :]         # (1, 128)

    # Layer 1: dense (B_TILE,128)@(128,128) on the MXU; bias + ReLU on the VPU.
    h = jnp.dot(x_ref[...], w1, preferred_element_type=jnp.float32)
    h = jnp.maximum(h + b1, 0.0)

    # Layer 2: lane-dense 128-wide output (real logits occupy the first
    # n_actions columns; padded columns are exactly zero + zero bias).
    y = jnp.dot(h, w2, preferred_element_type=jnp.float32)
    o_ref[...] = (y + b2).astype(o_ref.dtype)


def pack_params(w1, b1, w2, b2, dtype=jnp.float32):
    """Pack (W1, b1, W2, b2) into one zero-padded (264, 128) buffer."""
    obs_size, hidden = w1.shape
    n_actions = w2.shape[1]
    p = jnp.zeros((PARAM_ROWS, LANE), dtype)
    p = p.at[W1_ROW:W1_ROW + obs_size, :hidden].set(w1.astype(dtype))
    p = p.at[W2_ROW:W2_ROW + hidden, :n_actions].set(w2.astype(dtype))
    p = p.at[B1_ROW, :hidden].set(b1.reshape(-1).astype(dtype))
    p = p.at[B2_ROW, :n_actions].set(b2.reshape(-1).astype(dtype))
    return p


@functools.partial(jax.jit, static_argnames=("n_actions",))
def brain_forward(x, packed_params, n_actions):
    """x: (B, obs_size) f32; packed_params: (264, 128) f32 -> (B, n_actions)."""
    B, obs_size = x.shape
    # Zero-pad batch to a multiple of B_TILE and features to 128 lanes so all
    # kernel accesses are unmasked and lane-dense.
    B_pad = pl.cdiv(B, B_TILE) * B_TILE
    x_p = jnp.zeros((B_pad, LANE), x.dtype).at[:B, :obs_size].set(x)

    n_tiles = B_pad // B_TILE
    out_pad = pl.pallas_call(
        brain_kernel,
        out_shape=jax.ShapeDtypeStruct((B_pad, LANE), x.dtype),
        grid_spec=pltpu.PrefetchScalarGridSpec(
            num_scalar_prefetch=0,
            grid=(n_tiles,),
            in_specs=[
                pl.BlockSpec((B_TILE, LANE), lambda i: (i, 0)),       # x tile
                pl.BlockSpec((PARAM_ROWS, LANE), lambda i: (0, 0)),   # params (VMEM-resident)
            ],
            out_specs=pl.BlockSpec((B_TILE, LANE), lambda i: (i, 0)),
        ),
        compiler_params=pltpu.CompilerParams(
            # Batch tiles are independent -> shard across both TCs on v7x.
            dimension_semantics=("parallel",),
        ),
    )(x_p, packed_params)

    return out_pad[:B, :n_actions]


if __name__ == "__main__":
    # Shapes implied by the module: obs_size=16, hidden=32, n_actions=6.
    # Batch = 256 observations (a small rollout) so the grid actually has
    # multiple tiles and the launch cost is amortized.
    OBS, HID, ACT = 16, 32, 6
    B = 256

    key = jax.random.PRNGKey(0)
    kx, k1, k2, k3, k4 = jax.random.split(key, 5)
    lim1 = 1.0 / jnp.sqrt(OBS)
    lim2 = 1.0 / jnp.sqrt(HID)
    w1 = jax.random.uniform(k1, (OBS, HID), jnp.float32, -lim1, lim1)
    b1 = jax.random.uniform(k2, (HID,), jnp.float32, -lim1, lim1)
    w2 = jax.random.uniform(k3, (HID, ACT), jnp.float32, -lim2, lim2)
    b2 = jax.random.uniform(k4, (ACT,), jnp.float32, -lim2, lim2)
    x = jax.random.normal(kx, (B, OBS), jnp.float32)

    params = pack_params(w1, b1, w2, b2)
    out = jax.block_until_ready(brain_forward(x, params, ACT))

    # Pure-JAX reference of the same forward pass.
    ref = jnp.maximum(x @ w1 + b1, 0.0) @ w2 + b2
    assert out.shape == (B, ACT)
    assert jnp.allclose(out, ref, atol=1e-5, rtol=1e-5)

    print("KERNEL_OK")
</pallas_src>

<mosaic_0001>
module attributes {stable_mosaic.version = 11 : i64} {
  func.func @brain_kernel(%arg0: i32, %arg1: memref<128x128xf32, #tpu.memory_space<vmem>>, %arg2: memref<264x128xf32, #tpu.memory_space<vmem>>, %arg3: memref<128x128xf32, #tpu.memory_space<vmem>>) attributes {dimension_semantics = [#tpu.dimension_semantics<parallel>], iteration_bounds = array<i64: 2>, scalar_prefetch = 0 : i64, scratch_operands = 0 : i64, tpu.core_type = #tpu.core_type<tc>, window_params = [{transform_indices = @transform_0, window_bounds = array<i64: 128, 128>}, {pipeline_mode = #tpu.pipeline_mode<synchronous>, transform_indices = @transform_1, window_bounds = array<i64: 264, 128>}, {transform_indices = @transform_2, window_bounds = array<i64: 128, 128>}]} {
    %c0 = arith.constant 0 : index
    %c0_0 = arith.constant 0 : index
    %0 = vector.load %arg2[%c0, %c0_0] : memref<264x128xf32, #tpu.memory_space<vmem>>, vector<128x128xf32>
    %c128 = arith.constant 128 : index
    %c0_1 = arith.constant 0 : index
    %1 = vector.load %arg2[%c128, %c0_1] : memref<264x128xf32, #tpu.memory_space<vmem>>, vector<128x128xf32>
    %c256 = arith.constant 256 : index
    %c0_2 = arith.constant 0 : index
    %2 = vector.load %arg2[%c256, %c0_2] : memref<264x128xf32, #tpu.memory_space<vmem>>, vector<1x128xf32>
    %c257 = arith.constant 257 : index
    %c0_3 = arith.constant 0 : index
    %3 = vector.load %arg2[%c257, %c0_3] : memref<264x128xf32, #tpu.memory_space<vmem>>, vector<1x128xf32>
    %c0_4 = arith.constant 0 : index
    %c0_5 = arith.constant 0 : index
    %4 = vector.load %arg1[%c0_4, %c0_5] : memref<128x128xf32, #tpu.memory_space<vmem>>, vector<128x128xf32>
    %cst = arith.constant dense<0.000000e+00> : vector<128x128xf32>
    %5 = tpu.matmul %4, %0, %cst {dimension_numbers = #tpu.dot_dimension_numbers<[1], [0], [0], [1], [0, 0, 1, 1], [], []>} : vector<128x128xf32>, vector<128x128xf32>, vector<128x128xf32> -> vector<128x128xf32>
    %6 = vector.broadcast %2 : vector<1x128xf32> to vector<128x128xf32>
    %7 = arith.addf %5, %6 : vector<128x128xf32>
    %cst_6 = arith.constant 0.000000e+00 : f32
    %8 = vector.broadcast %cst_6 : f32 to vector<128x128xf32>
    %9 = arith.maximumf %7, %8 : vector<128x128xf32>
    %cst_7 = arith.constant dense<0.000000e+00> : vector<128x128xf32>
    %10 = tpu.matmul %9, %1, %cst_7 {dimension_numbers = #tpu.dot_dimension_numbers<[1], [0], [0], [1], [0, 0, 1, 1], [], []>} : vector<128x128xf32>, vector<128x128xf32>, vector<128x128xf32> -> vector<128x128xf32>
    %11 = vector.broadcast %3 : vector<1x128xf32> to vector<128x128xf32>
    %12 = arith.addf %10, %11 : vector<128x128xf32>
    %c0_8 = arith.constant 0 : index
    %c0_9 = arith.constant 0 : index
    %13 = vector.load %arg3[%c0_8, %c0_9] : memref<128x128xf32, #tpu.memory_space<vmem>>, vector<128x128xf32>
    tpu.vector_store %arg3[%c0_8, %c0_9], %12 {strides = array<i32>} : memref<128x128xf32, #tpu.memory_space<vmem>>, vector<128x128xf32>,
    return
  }
  func.func @transform_0(%arg0: i32) -> (i32, i32) {
    %c0_i32 = arith.constant 0 : i32
    %c0_i32_0 = arith.constant 0 : i32
    return %arg0, %c0_i32 : i32, i32
  }
  func.func @transform_1(%arg0: i32) -> (i32, i32) {
    %c0_i32 = arith.constant 0 : i32
    %c0_i32_0 = arith.constant 0 : i32
    %c0_i32_1 = arith.constant 0 : i32
    return %c0_i32, %c0_i32_0 : i32, i32
  }
  func.func @transform_2(%arg0: i32) -> (i32, i32) {
    %c0_i32 = arith.constant 0 : i32
    %c0_i32_0 = arith.constant 0 : i32
    return %arg0, %c0_i32 : i32, i32
  }
}

</mosaic_0001>

<bundles_post_ra>
// kernel: brain_forward.1
= control target key start
LH: loop header
LB: loop body
LE: loop exit
PB: predicated region body
PF: predicated region fallthrough
CT: control target
= control target key end

     0   :  { %s493_s9 = smov 0   ;;  %s655_s0 = inlined_call_operand.vmem [shape: f32[256,128], index: 0, kind: input, shape index: {}]   ;;  %s656_s1 = inlined_call_operand.vmem [shape: f32[264,128], index: 1, kind: input, shape index: {}]   ;;  %s657_s2 = inlined_call_operand.vmem [shape: f32[256,128], index: 2, kind: output, shape index: {}]  }
   0x1 LB: > { %s417_s10 = sadd.s32 4294967295, %s476_s9   ;;  %p421_p0 = scmp.ge.s32.totalorder %s476_s9, 1  ;;  %s476_s9 = sphi %s493_s9, %s12_s9  }
   0x2   : > { %p113_p1 = scmp.lt.s32.totalorder %s476_s9, 3 }
   0x4   : > { %p114_p2 = pnand %p421_p0, %p113_p1 }
   0x5   : > { %s422_s27 = sshll.u32 (!%p114_p2), %s417_s10, 4 }
   0x6   : > { %117 = sbr.rel (%p114_p2) target bundleno = 370 (0x172), region = 28  ;;  %p136_p3 = scmp.lt.s32.totalorder (!%p114_p2), %s422_s27, 31 }
   0xb   : > { %v162_v0 = vld [vmem:[%s656_s1 + $0x78] sm:$0xff]  ;;  %v161_v1 = vld [vmem:[%s656_s1 + $0x70] sm:$0xff]  ;;  %v160_v2 = vld [vmem:[%s656_s1 + $0x68] sm:$0xff]  ;;  %s659_s27 = smov (!%p136_p3, %s422_s27), 31 }
   0xc   : > { %428 = vmatpush.msra.mxu2 %v162_v0  ;;  %198 = vmatpush.msra.mxu0 %v162_v0  ;;  %v159_v3 = vld [vmem:[%s656_s1 + $0x60] sm:$0xff]  ;;  %v158_v4 = vld [vmem:[%s656_s1 + $0x58] sm:$0xff]  ;;  %v157_v5 = vld [vmem:[%s656_s1 + $0x50] sm:$0xff]  ;;  %s423_s11 = sshll.u32 %s659_s27, 3 }
   0xd   : > { %v156_v6 = vld [vmem:[%s656_s1 + $0x48] sm:$0xff]  ;;  %v155_v7 = vld [vmem:[%s656_s1 + $0x40] sm:$0xff]  ;;  %v154_v8 = vld [vmem:[%s656_s1 + $0x38] sm:$0xff]  ;;  %s554_s18 = scalar_lea.vmem %s655_s0, %s423_s11  ;;  %s634_s7 = scalar_lea.vmem %s657_s2, %s423_s11 }
   0xe   : > { %429 = vmatpush.msra.mxu2 %v161_v1  ;;  %199 = vmatpush.msra.mxu0 %v161_v1  ;;  %v153_v9 = vld [vmem:[%s656_s1 + $0x30] sm:$0xff]  ;;  %v152_v10 = vld [vmem:[%s656_s1 + $0x28] sm:$0xff]  ;;  %v151_v11 = vld [vmem:[%s656_s1 + $0x20] sm:$0xff] }
   0xf   : > { %v150_v12 = vld [vmem:[%s656_s1 + $0x18] sm:$0xff]  ;;  %v149_v13 = vld [vmem:[%s656_s1 + $0x10] sm:$0xff]  ;;  %v148_v14 = vld [vmem:[%s656_s1 + $0x8] sm:$0xff] }
  0x10   : > { %430 = vmatpush.msra.mxu2 %v160_v2  ;;  %200 = vmatpush.msra.mxu0 %v160_v2  ;;  %v147_v15 = vld [vmem:[%s656_s1] sm:$0xff]  ;;  %v190_v18 = vld [vmem:[%s554_s18 + $0x48] sm:$0xff]  ;;  %v191_v20 = vld [vmem:[%s554_s18 + $0x50] sm:$0xff] }
  0x11   : > { %v189_v16 = vld [vmem:[%s554_s18 + $0x40] sm:$0xff]  ;;  %v182_v19 = vld [vmem:[%s554_s18 + $0x8] sm:$0xff]  ;;  %v183_v21 = vld [vmem:[%s554_s18 + $0x10] sm:$0xff] }
  0x12   : > { %431 = vmatpush.msra.mxu2 %v159_v3  ;;  %201 = vmatpush.msra.mxu0 %v159_v3  ;;  %v181_v17 = vld [vmem:[%s554_s18] sm:$0xff]  ;;  %v192_v22 = vld [vmem:[%s554_s18 + $0x58] sm:$0xff]  ;;  %v177_v25 = vld [vmem:[%s656_s1 + $0xf0] sm:$0xff] }
  0x13   : > { %v184_v23 = vld [vmem:[%s554_s18 + $0x18] sm:$0xff]  ;;  %v176_v26 = vld [vmem:[%s656_s1 + $0xe8] sm:$0xff]  ;;  %v175_v27 = vld [vmem:[%s656_s1 + $0xe0] sm:$0xff] }
  0x14   : > { %432 = vmatpush.msra.mxu2 %v158_v4  ;;  %202 = vmatpush.msra.mxu0 %v158_v4  ;;  %v178_v24 = vld [vmem:[%s656_s1 + $0xf8] sm:$0xff]  ;;  %v193_v28 = vld [vmem:[%s554_s18 + $0x60] sm:$0xff]  ;;  %v173_v31 = vld [vmem:[%s656_s1 + $0xd0] sm:$0xff] }
  0x15   : > { %444 = vmatpush.msra.mxu3 %v178_v24  ;;  %280 = vmatpush.msra.mxu1 %v178_v24  ;;  %v185_v29 = vld [vmem:[%s554_s18 + $0x20] sm:$0xff]  ;;  %v174_v30 = vld [vmem:[%s656_s1 + $0xd8] sm:$0xff]  ;;  %v172_v32 = vld [vmem:[%s656_s1 + $0xc8] sm:$0xff] }
  0x16   : > { %433 = vmatpush.msra.mxu2 %v157_v5  ;;  %203 = vmatpush.msra.mxu0 %v157_v5  ;;  %v171_v33 = vld [vmem:[%s656_s1 + $0xc0] sm:$0xff]  ;;  %v194_v34 = vld [vmem:[%s554_s18 + $0x68] sm:$0xff]  ;;  %v170_v36 = vld [vmem:[%s656_s1 + $0xb8] sm:$0xff] }
  0x17   : > { %445 = vmatpush.msra.mxu3 %v177_v25  ;;  %281 = vmatpush.msra.mxu1 %v177_v25  ;;  %v186_v35 = vld [vmem:[%s554_s18 + $0x28] sm:$0xff]  ;;  %v169_v37 = vld [vmem:[%s656_s1 + $0xb0] sm:$0xff]  ;;  %v167_v39 = vld [vmem:[%s656_s1 + $0xa0] sm:$0xff] }
  0x18   : > { %434 = vmatpush.msra.mxu2 %v156_v6  ;;  %204 = vmatpush.msra.mxu0 %v156_v6  ;;  %v168_v38 = vld [vmem:[%s656_s1 + $0xa8] sm:$0xff]  ;;  %v195_v40 = vld [vmem:[%s554_s18 + $0x70] sm:$0xff]  ;;  %v166_v42 = vld [vmem:[%s656_s1 + $0x98] sm:$0xff] }
  0x19   : > { %446 = vmatpush.msra.mxu3 %v176_v26  ;;  %282 = vmatpush.msra.mxu1 %v176_v26  ;;  %v187_v41 = vld [vmem:[%s554_s18 + $0x30] sm:$0xff]  ;;  %v196_v43 = vld [vmem:[%s554_s18 + $0x78] sm:$0xff]  ;;  %v164_v46 = vld [vmem:[%s656_s1 + $0x88] sm:$0xff] }
  0x1a   : > { %435 = vmatpush.msra.mxu2 %v155_v7  ;;  %205 = vmatpush.msra.mxu0 %v155_v7  ;;  %v188_v44 = vld [vmem:[%s554_s18 + $0x38] sm:$0xff]  ;;  %v165_v45 = vld [vmem:[%s656_s1 + $0x90] sm:$0xff]  ;;  %v163_v47 = vld [vmem:[%s656_s1 + $0x80] sm:$0xff] }
  0x1b   : > { %447 = vmatpush.msra.mxu3 %v175_v27  ;;  %283 = vmatpush.msra.mxu1 %v175_v27  ;;  %v468_v48 = vld [vmem:[%s656_s1 + $0x100] ss:$0 sm:$0xff] }
  0x1c   : > { %436 = vmatpush.msra.mxu2 %v154_v8  ;;  %206 = vmatpush.msra.mxu0 %v154_v8 }
  0x1d   : > { %448 = vmatpush.msra.mxu3 %v174_v30  ;;  %284 = vmatpush.msra.mxu1 %v174_v30 }
  0x1e   : > { %437 = vmatpush.msra.mxu2 %v153_v9  ;;  %207 = vmatpush.msra.mxu0 %v153_v9 }
  0x1f   : > { %449 = vmatpush.msra.mxu3 %v173_v31  ;;  %285 = vmatpush.msra.mxu1 %v173_v31 }
  0x20   : > { %438 = vmatpush.msra.mxu2 %v152_v10  ;;  %208 = vmatpush.msra.mxu0 %v152_v10 }
  0x21   : > { %450 = vmatpush.msra.mxu3 %v172_v32  ;;  %286 = vmatpush.msra.mxu1 %v172_v32 }
  0x22   : > { %439 = vmatpush.msra.mxu2 %v151_v11  ;;  %209 = vmatpush.msra.mxu0 %v151_v11 }
  0x23   : > { %451 = vmatpush.msra.mxu3 %v171_v33  ;;  %287 = vmatpush.msra.mxu1 %v171_v33  ;;  %v469_v33 = vld [vmem:[%s656_s1 + $0x101] ss:$0 sm:$0xff] }
  0x24   : > { %440 = vmatpush.msra.mxu2 %v150_v12  ;;  %210 = vmatpush.msra.mxu0 %v150_v12 }
  0x25   : > { %452 = vmatpush.msra.mxu3 %v170_v36  ;;  %288 = vmatpush.msra.mxu1 %v170_v36 }
  0x26   : > { %441 = vmatpush.msra.mxu2 %v149_v13  ;;  %211 = vmatpush.msra.mxu0 %v149_v13 }
  0x27   : > { %453 = vmatpush.msra.mxu3 %v169_v37  ;;  %289 = vmatpush.msra.mxu1 %v169_v37 }
  0x28   : > { %442 = vmatpush.msra.mxu2 %v148_v14  ;;  %212 = vmatpush.msra.mxu0 %v148_v14 }
  0x29   : > { %454 = vmatpush.msra.mxu3 %v168_v38  ;;  %290 = vmatpush.msra.mxu1 %v168_v38 }
  0x2a   : > { %443 = vmatpush.msra.mxu2 %v147_v15  ;;  %213 = vmatpush.msra.mxu0 %v147_v15 }
  0x2b   : > { %238 = vmatmul.f32.vlgmr.msra.gmra.mxu2 %v189_v16  ;;  %214 = vmatmul.f32.vlgmr.msra.gmra.mxu0 %v181_v17 }
  0x2c   : > { %455 = vmatpush.msra.mxu3 %v167_v39  ;;  %291 = vmatpush.msra.mxu1 %v167_v39 }
  0x2e   : > { %456 = vmatpush.msra.mxu3 %v166_v42  ;;  %292 = vmatpush.msra.mxu1 %v166_v42 }
  0x30   : > { %457 = vmatpush.msra.mxu3 %v165_v45  ;;  %293 = vmatpush.msra.mxu1 %v165_v45 }
  0x32   : > { %458 = vmatpush.msra.mxu3 %v164_v46  ;;  %294 = vmatpush.msra.mxu1 %v164_v46 }
  0x33   : > { %241 = vmatmul.f32.gmra.mxu2 %v190_v18  ;;  %217 = vmatmul.f32.gmra.mxu0 %v182_v19 }
  0x34   : > { %459 = vmatpush.msra.mxu3 %v163_v47  ;;  %295 = vmatpush.msra.mxu1 %v163_v47 }
  0x3b   : > { %244 = vmatmul.f32.gmra.mxu2 %v191_v20  ;;  %220 = vmatmul.f32.gmra.mxu0 %v183_v21 }
  0x43   : > { %247 = vmatmul.f32.gmra.mxu2 %v192_v22  ;;  %223 = vmatmul.f32.gmra.mxu0 %v184_v23 }
  0x4b   : > { %250 = vmatmul.f32.gmra.mxu2 %v193_v28  ;;  %226 = vmatmul.f32.gmra.mxu0 %v185_v29 }
  0x53   : > { %253 = vmatmul.f32.gmra.mxu2 %v194_v34  ;;  %229 = vmatmul.f32.gmra.mxu0 %v186_v35 }
  0x5b   : > { %256 = vmatmul.f32.gmra.mxu2 %v195_v40  ;;  %232 = vmatmul.f32.gmra.mxu0 %v187_v41 }
  0x63   : > { %259 = vmatmul.f32.gmra.mxu2 %v196_v43  ;;  %235 = vmatmul.f32.gmra.mxu0 %v188_v44 }
  0xa8   : > { %v215_v49 = vpop.f32.mrf.mxu0 }
  0xa9   : > { %v216_v50 = vadd.f32 %v468_v48, %v215_v49 }
  0xab   : > { %v263_v51 = vmax.f32 %v216_v50, 0.0 }
  0xad   : > { %296 = vmatmul.f32.vlgmr.msra.gmra.mxu1 %v263_v51 }
  0xae   : > { %v239_v52 = vpop.f32.mrf.mxu2 }
  0xaf   : > { %v240_v53 = vadd.f32 %v468_v48, %v239_v52 }
  0xb0   : > { %v218_v54 = vpop.f32.mrf.mxu0 }
  0xb1   : > { %v271_v55 = vmax.f32 %v240_v53, 0.0  ;;  %v219_v56 = vadd.f32 %v468_v48, %v218_v54 }
  0xb3   : > { %320 = vmatmul.f32.vlgmr.msra.gmra.mxu3 %v271_v55  ;;  %v264_v57 = vmax.f32 %v219_v56, 0.0 }
  0xb5   : > { %299 = vmatmul.f32.gmra.mxu1 %v264_v57 }
  0xb6   : > { %v242_v58 = vpop.f32.mrf.mxu2 }
  0xb7   : > { %v243_v59 = vadd.f32 %v468_v48, %v242_v58 }
  0xb8   : > { %v221_v60 = vpop.f32.mrf.mxu0 }
  0xb9   : > { %v272_v61 = vmax.f32 %v243_v59, 0.0  ;;  %v222_v62 = vadd.f32 %v468_v48, %v221_v60 }
  0xbb   : > { %323 = vmatmul.f32.gmra.mxu3 %v272_v61  ;;  %v265_v63 = vmax.f32 %v222_v62, 0.0 }
  0xbd   : > { %302 = vmatmul.f32.gmra.mxu1 %v265_v63 }
  0xbe   : > { %v245_v0 = vpop.f32.mrf.mxu2 }
  0xbf   : > { %v246_v1 = vadd.f32 %v468_v48, %v245_v0 }
  0xc0   : > { %v224_v2 = vpop.f32.mrf.mxu0 }
  0xc1   : > { %v273_v3 = vmax.f32 %v246_v1, 0.0  ;;  %v225_v4 = vadd.f32 %v468_v48, %v224_v2 }
  0xc3   : > { %326 = vmatmul.f32.gmra.mxu3 %v273_v3  ;;  %v266_v5 = vmax.f32 %v225_v4, 0.0 }
  0xc5   : > { %305 = vmatmul.f32.gmra.mxu1 %v266_v5 }
  0xc6   : > { %v248_v6 = vpop.f32.mrf.mxu2 }
  0xc7   : > { %v249_v7 = vadd.f32 %v468_v48, %v248_v6 }
  0xc8   : > { %v227_v8 = vpop.f32.mrf.mxu0 }
  0xc9   : > { %v274_v9 = vmax.f32 %v249_v7, 0.0  ;;  %v228_v10 = vadd.f32 %v468_v48, %v227_v8 }
  0xcb   : > { %329 = vmatmul.f32.gmra.mxu3 %v274_v9  ;;  %v267_v11 = vmax.f32 %v228_v10, 0.0 }
  0xcd   : > { %308 = vmatmul.f32.gmra.mxu1 %v267_v11 }
  0xce   : > { %v251_v12 = vpop.f32.mrf.mxu2 }
  0xcf   : > { %v252_v13 = vadd.f32 %v468_v48, %v251_v12 }
  0xd0   : > { %v230_v14 = vpop.f32.mrf.mxu0 }
  0xd1   : > { %v275_v15 = vmax.f32 %v252_v13, 0.0  ;;  %v231_v16 = vadd.f32 %v468_v48, %v230_v14 }
  0xd3   : > { %332 = vmatmul.f32.gmra.mxu3 %v275_v15  ;;  %v268_v17 = vmax.f32 %v231_v16, 0.0 }
  0xd5   : > { %311 = vmatmul.f32.gmra.mxu1 %v268_v17 }
  0xd6   : > { %v254_v18 = vpop.f32.mrf.mxu2 }
  0xd7   : > { %v255_v19 = vadd.f32 %v468_v48, %v254_v18 }
  0xd8   : > { %v233_v20 = vpop.f32.mrf.mxu0 }
  0xd9   : > { %v276_v21 = vmax.f32 %v255_v19, 0.0  ;;  %v234_v22 = vadd.f32 %v468_v48, %v233_v20 }
  0xdb   : > { %335 = vmatmul.f32.gmra.mxu3 %v276_v21  ;;  %v269_v23 = vmax.f32 %v234_v22, 0.0 }
  0xdd   : > { %314 = vmatmul.f32.gmra.mxu1 %v269_v23 }
  0xde   : > { %v257_v24 = vpop.f32.mrf.mxu2 }
  0xdf   : > { %v258_v25 = vadd.f32 %v468_v48, %v257_v24 }
  0xe0   : > { %v236_v26 = vpop.f32.mrf.mxu0 }
  0xe1   : > { %v277_v27 = vmax.f32 %v258_v25, 0.0  ;;  %v237_v28 = vadd.f32 %v468_v48, %v236_v26 }
  0xe3   : > { %338 = vmatmul.f32.gmra.mxu3 %v277_v27  ;;  %v270_v29 = vmax.f32 %v237_v28, 0.0 }
  0xe5   : > { %317 = vmatmul.f32.gmra.mxu1 %v270_v29 }
  0xe6   : > { %v260_v30 = vpop.f32.mrf.mxu2 }
  0xe7   : > { %v261_v31 = vadd.f32 %v468_v48, %v260_v30 }
  0xe9   : > { %v278_v32 = vmax.f32 %v261_v31, 0.0 }
  0xeb   : > { %341 = vmatmul.f32.gmra.mxu3 %v278_v32 }
 0x12a   : > { %v297_v34 = vpop.f32.mrf.mxu1 }
 0x12b   : > { %v298_v35 = vadd.f32 %v469_v33, %v297_v34 }
 0x12d   : > { %345 = vst [vmem:[%s634_s7] sm:$0xff] %v298_v35 }
 0x132   : > { %v300_v36 = vpop.f32.mrf.mxu1 }
 0x133   : > { %v301_v37 = vadd.f32 %v469_v33, %v300_v36 }
 0x135   : > { %346 = vst [vmem:[%s634_s7 + $0x8] sm:$0xff] %v301_v37 }
 0x136   : > { %v321_v38 = vpop.f32.mrf.mxu3 }
 0x137   : > { %v322_v39 = vadd.f32 %v469_v33, %v321_v38 }
 0x139   : > { %353 = vst [vmem:[%s634_s7 + $0x40] sm:$0xff] %v322_v39 }
 0x13a   : > { %v303_v40 = vpop.f32.mrf.mxu1 }
 0x13b   : > { %v304_v41 = vadd.f32 %v469_v33, %v303_v40 }
 0x13d   : > { %347 = vst [vmem:[%s634_s7 + $0x10] sm:$0xff] %v304_v41 }
 0x13e   : > { %v324_v42 = vpop.f32.mrf.mxu3 }
 0x13f   : > { %v325_v43 = vadd.f32 %v469_v33, %v324_v42 }
 0x141   : > { %354 = vst [vmem:[%s634_s7 + $0x48] sm:$0xff] %v325_v43 }
 0x142   : > { %v306_v44 = vpop.f32.mrf.mxu1 }
 0x143   : > { %v307_v45 = vadd.f32 %v469_v33, %v306_v44 }
 0x145   : > { %348 = vst [vmem:[%s634_s7 + $0x18] sm:$0xff] %v307_v45 }
 0x146   : > { %v327_v46 = vpop.f32.mrf.mxu3 }
 0x147   : > { %v328_v47 = vadd.f32 %v469_v33, %v327_v46 }
 0x149   : > { %355 = vst [vmem:[%s634_s7 + $0x50] sm:$0xff] %v328_v47 }
 0x14a   : > { %v309_v48 = vpop.f32.mrf.mxu1 }
 0x14b   : > { %v310_v49 = vadd.f32 %v469_v33, %v309_v48 }
 0x14d   : > { %349 = vst [vmem:[%s634_s7 + $0x20] sm:$0xff] %v310_v49 }
 0x14e   : > { %v330_v50 = vpop.f32.mrf.mxu3 }
 0x14f   : > { %v331_v51 = vadd.f32 %v469_v33, %v330_v50 }
 0x151   : > { %356 = vst [vmem:[%s634_s7 + $0x58] sm:$0xff] %v331_v51 }
 0x152   : > { %v312_v52 = vpop.f32.mrf.mxu1 }
 0x153   : > { %v313_v53 = vadd.f32 %v469_v33, %v312_v52 }
 0x155   : > { %350 = vst [vmem:[%s634_s7 + $0x28] sm:$0xff] %v313_v53 }
 0x156   : > { %v333_v54 = vpop.f32.mrf.mxu3 }
 0x157   : > { %v334_v55 = vadd.f32 %v469_v33, %v333_v54 }
 0x159   : > { %357 = vst [vmem:[%s634_s7 + $0x60] sm:$0xff] %v334_v55 }
 0x15a   : > { %v315_v56 = vpop.f32.mrf.mxu1 }
 0x15b   : > { %v316_v57 = vadd.f32 %v469_v33, %v315_v56 }
 0x15d   : > { %351 = vst [vmem:[%s634_s7 + $0x30] sm:$0xff] %v316_v57 }
 0x15e   : > { %v336_v58 = vpop.f32.mrf.mxu3 }
 0x15f   : > { %v337_v59 = vadd.f32 %v469_v33, %v336_v58 }
 0x161   : > { %358 = vst [vmem:[%s634_s7 + $0x68] sm:$0xff] %v337_v59 }
 0x162   : > { %v318_v60 = vpop.f32.mrf.mxu1 }
 0x163   : > { %v319_v61 = vadd.f32 %v469_v33, %v318_v60 }
 0x165   : > { %352 = vst [vmem:[%s634_s7 + $0x38] sm:$0xff] %v319_v61 }
 0x166   : > { %v339_v62 = vpop.f32.mrf.mxu3 }
 0x167   : > { %v340_v63 = vadd.f32 %v469_v33, %v339_v62 }
 0x169   : > { %359 = vst [vmem:[%s634_s7 + $0x70] sm:$0xff] %v340_v63 }
 0x16e   : > { %v342_v0 = vpop.f32.mrf.mxu3 }
 0x16f   : > { %v343_v1 = vadd.f32 %v469_v33, %v342_v0 }
 0x171   : > { %360 = vst [vmem:[%s634_s7 + $0x78] sm:$0xff] %v343_v1 }
 0x172 PF: > { %s12_s9 = sadd.s32 1, %s476_s9  }
 0x173   : > { %p9_p4 = scmp.ge.s32.totalorder %s12_s9, 4  }
 0x175   :  { %11 = sbr.rel (!%p9_p4) target bundleno = 1 (0x1), region = 58 }

</bundles_post_ra>
